<compile_context>
chip_gen: v7x
topology: tpu7x:2x2x1
jax: 0.10.0
libtpu: 0.0.40
codegen_flags: <defaults>
</compile_context>

<pallas_src>
import functools

import jax
import jax.numpy as jnp
from jax.experimental import pallas as pl
from jax.experimental.pallas import tpu as pltpu


def _dtype_min(dtype):
    if jnp.issubdtype(dtype, jnp.floating):
        return jnp.array(-jnp.inf, dtype)
    return jnp.array(jnp.iinfo(dtype).min, dtype)


def _sublane_multiple(itemsize):
    # Sub-32-bit dtypes pack along sublanes: bf16 -> 16 rows/vreg, int8 -> 32.
    return {4: 8, 2: 16, 1: 32}.get(itemsize, 8)


def _rowmax_single_kernel(x_ref, o_ref):
    # Single reduction step: the whole row segment is resident -> one reduce.
    o_ref[...] = jnp.max(x_ref[...], axis=-1, keepdims=True)


def _rowmax_multi_kernel(x_ref, o_ref, *, kt, total_k, mask_last):
    k = pl.program_id(1)
    x = x_ref[...]
    if mask_last:
        # Ragged last reduction tile: out-of-bounds lanes hold undefined data;
        # replace them with the dtype minimum so they cannot win the max.
        valid = total_k - k * kt  # scalar; >= kt for every non-last tile
        col = jax.lax.broadcasted_iota(jnp.int32, x.shape, dimension=1)
        x = jnp.where(col < valid, x, _dtype_min(x.dtype))
    tile_max = jnp.max(x, axis=-1, keepdims=True)

    @pl.when(k == 0)
    def _():
        o_ref[...] = tile_max

    @pl.when(k > 0)
    def _():
        o_ref[...] = jnp.maximum(o_ref[...], tile_max)


def _row_max_pallas(x2d, target_block_bytes, vmem_limit_bytes):
    R, K = x2d.shape
    dtype = x2d.dtype
    itemsize = jnp.dtype(dtype).itemsize
    sub = _sublane_multiple(itemsize)

    # Reduction (column) tile: prefer the full row (fully contiguous DMA per
    # block).  When a split is unavoidable, keep kt as large as the block
    # budget allows at the minimum legal block height (sub rows), so DMA
    # segments stay long and rt shrinks instead of kt.
    max_col_elems = max(128, target_block_bytes // (itemsize * sub))
    if K <= max_col_elems:
        kt = K
    else:
        kt = (max_col_elems // 128) * 128

    # Row tile: fill the block budget, round to the dtype-aware sublane
    # multiple, and keep >=2 programs along the parallel axis (v7x megacore).
    rows_per_block = max(1, target_block_bytes // (kt * itemsize))
    if R <= sub:
        rt = R  # full-extent block height is always legal
    else:
        rt = max(sub, (rows_per_block // sub) * sub)
        if R >= 2 * sub:
            half = -(-R // 2)
            rt = min(rt, max(sub, (half // sub) * sub))
        rt = min(rt, -(-R // sub) * sub)

    grid_r = pl.cdiv(R, rt)
    grid_k = pl.cdiv(K, kt)

    cost = pl.CostEstimate(
        flops=R * K,
        transcendentals=0,
        bytes_accessed=R * K * itemsize + R * itemsize,
    )

    if grid_k == 1:
        return pl.pallas_call(
            _rowmax_single_kernel,
            out_shape=jax.ShapeDtypeStruct((R, 1), dtype),
            grid_spec=pltpu.PrefetchScalarGridSpec(
                num_scalar_prefetch=0,
                grid=(grid_r,),
                in_specs=[pl.BlockSpec((rt, K), lambda i: (i, 0))],
                out_specs=pl.BlockSpec((rt, 1), lambda i: (i, 0)),
            ),
            compiler_params=pltpu.CompilerParams(
                dimension_semantics=("parallel",),
                vmem_limit_bytes=vmem_limit_bytes),
            cost_estimate=cost,
        )(x2d)

    # Multi-step reduction: output block held resident across the reduction
    # axis (accumulator pattern), reduction axis marked "arbitrary".
    # TODO(synk): sweep pipeline_mode=pl.Buffered(3) on the input spec if
    # profiling shows exposed DMA gaps between reduction steps.
    kernel = functools.partial(_rowmax_multi_kernel, kt=kt, total_k=K,
                               mask_last=(K % kt != 0))
    return pl.pallas_call(
        kernel,
        out_shape=jax.ShapeDtypeStruct((R, 1), dtype),
        grid_spec=pltpu.PrefetchScalarGridSpec(
            num_scalar_prefetch=0,
            grid=(grid_r, grid_k),
            in_specs=[pl.BlockSpec((rt, kt), lambda i, k: (i, k))],
            out_specs=pl.BlockSpec((rt, 1), lambda i, k: (i, 0)),
        ),
        compiler_params=pltpu.CompilerParams(
            dimension_semantics=("parallel", "arbitrary"),
            vmem_limit_bytes=vmem_limit_bytes),
        cost_estimate=cost,
    )(x2d)


def max_pool2d_flatten_pallas(x, *, target_block_bytes=8 << 20,
                              vmem_limit_bytes=48 << 20,
                              min_pallas_bytes=1 << 20):
    """Pallas port of MaxPool2DFlatten.forward (NCHW input)."""
    N, C, H, W = x.shape
    assert H == W, "MaxPool2DFlatten requires square spatial dims"
    R, K = N * C, H * W
    itemsize = jnp.dtype(x.dtype).itemsize

    if R * K * itemsize < min_pallas_bytes:
        # Small-input fast path: plain XLA reduce fuses with neighbours and
        # avoids the fixed pallas_call / grid-step overhead.
        pooled = jnp.max(x, axis=(2, 3))
    else:
        # Contiguous NCHW -> (N*C, H*W) reshape is free (no extra HBM pass).
        pooled = _row_max_pallas(
            x.reshape(R, K), target_block_bytes, vmem_limit_bytes
        ).reshape(N, C)

    # torch: x = F.max_pool2d(x, H).squeeze(); if batch_size == 1: unsqueeze(0)
    squeezed_shape = tuple(d for d in (N, C) if d != 1)
    y = pooled.reshape(squeezed_shape)
    if N == 1:
        y = y[None, ...]
    return y


if __name__ == "__main__":
    key = jax.random.PRNGKey(0)
    k0, k1, k2, k3 = jax.random.split(key, 4)

    # 1) Spec-sized input routed through the actual Pallas kernel.
    x_small = jax.random.normal(k0, (2, 4, 16, 16), dtype=jnp.float32)
    y_small = max_pool2d_flatten_pallas(x_small, min_pallas_bytes=0)
    jax.block_until_ready(y_small)
    assert y_small.shape == (2, 4) and y_small.dtype == x_small.dtype
    assert jnp.array_equal(y_small, jnp.max(x_small, axis=(2, 3)))

    # 2) Default path (small-input fast path) + batch==1 squeeze/unsqueeze.
    x_b1 = jax.random.normal(k1, (1, 4, 16, 16), dtype=jnp.float32)
    y_b1 = max_pool2d_flatten_pallas(x_b1)
    jax.block_until_ready(y_b1)
    assert y_b1.shape == (1, 4)
    assert jnp.array_equal(y_b1, jnp.max(x_b1, axis=(2, 3)))

    # 3) Large enough for the default Pallas path (single reduction step,
    #    >=2 programs on the parallel axis).
    x_big = jax.random.normal(k2, (2, 64, 128, 128), dtype=jnp.float32)
    y_big = max_pool2d_flatten_pallas(x_big)
    jax.block_until_ready(y_big)
    assert y_big.shape == (2, 64)
    assert jnp.array_equal(y_big, jnp.max(x_big, axis=(2, 3)))

    # 4) Exercise the multi-step reduction + ragged-tile masking path with a
    #    deliberately tiny block budget (K = 2500 is not a multiple of 128).
    x_rag = jax.random.normal(k3, (2, 8, 50, 50), dtype=jnp.float32)
    y_rag = max_pool2d_flatten_pallas(x_rag, target_block_bytes=4096,
                                      min_pallas_bytes=0)
    jax.block_until_ready(y_rag)
    assert y_rag.shape == (2, 8)
    assert jnp.array_equal(y_rag, jnp.max(x_rag, axis=(2, 3)))

    print("KERNEL_OK")
</pallas_src>

<mosaic_0001>
module attributes {stable_mosaic.version = 11 : i64} {
  func.func @_rowmax_single_kernel(%arg0: i32, %arg1: memref<8x256xf32, #tpu.memory_space<vmem>>, %arg2: memref<8x1xf32, #tpu.memory_space<vmem>>) attributes {dimension_semantics = [#tpu.dimension_semantics<parallel>], iteration_bounds = array<i64: 1>, scalar_prefetch = 0 : i64, scratch_operands = 0 : i64, tpu.core_type = #tpu.core_type<tc>, window_params = [{transform_indices = @transform_0, window_bounds = array<i64: 8, 256>}, {transform_indices = @transform_1, window_bounds = array<i64: 8, 1>}]} {
    %c0 = arith.constant 0 : index
    %c0_0 = arith.constant 0 : index
    %0 = vector.load %arg1[%c0, %c0_0] : memref<8x256xf32, #tpu.memory_space<vmem>>, vector<8x256xf32>
    %cst = arith.constant dense<0xFF800000> : vector<8xf32>
    %1 = vector.multi_reduction <maximumf>, %0, %cst [1] : vector<8x256xf32> to vector<8xf32>
    %2 = vector.shape_cast %1 : vector<8xf32> to vector<8x1xf32>
    %c0_1 = arith.constant 0 : index
    %c0_2 = arith.constant 0 : index
    %3 = vector.load %arg2[%c0_1, %c0_2] : memref<8x1xf32, #tpu.memory_space<vmem>>, vector<8x1xf32>
    tpu.vector_store %arg2[%c0_1, %c0_2], %2 {strides = array<i32>} : memref<8x1xf32, #tpu.memory_space<vmem>>, vector<8x1xf32>,
    return
  }
  func.func @transform_0(%arg0: i32) -> (i32, i32) {
    %c0_i32 = arith.constant 0 : i32
    %c0_i32_0 = arith.constant 0 : i32
    return %arg0, %c0_i32 : i32, i32
  }
  func.func @transform_1(%arg0: i32) -> (i32, i32) {
    %c0_i32 = arith.constant 0 : i32
    %c0_i32_0 = arith.constant 0 : i32
    return %arg0, %c0_i32 : i32, i32
  }
}

</mosaic_0001>

<bundles_post_ra>
// kernel: tpu_custom_call.1
= control target key start
LH: loop header
LB: loop body
LE: loop exit
PB: predicated region body
PF: predicated region fallthrough
CT: control target
= control target key end

     0   :  { %6 = vsyncpa [#allocation3], 0  ;;  %s57_s6 = smov [#allocation2]   ;;  %s83_s0 = inlined_call_operand.hbm [shape: f32[8,256], index: 0, kind: input, shape index: {}]   ;;  %s84_s1 = inlined_call_operand.vmem [shape: f32[8,1], index: 1, kind: output, shape index: {}]  }
   0x1   :  { %s13_s7 = sshll.u32 %s57_s6, 4  ;;  %s33_s10 = scalar_lea.hbm %s83_s0, 256  ;;  %s14_s7 = int_to_ptr.vmem [resolvable:$true] %s13_s7 }
   0x2   :  { %p34_p0 = scmp.ne.s32.totalorder %s83_s0, %s33_s10  ;;  %p37_p1 = scmp.lt.u32.totalorder %s33_s10, %s83_s0 }
   0x4   :  { %p39_p2 = pnand %p37_p1, %p34_p0 }
   0x6   :  { %42 = shalt.err (!%p39_p2)
}
   0x7   :  { %s43_s15 = scalar_lea.vmem %s14_s7, 256  ;;  %p48_p4 = scmp.lt.s32.totalorder %s14_s7, %s14_s7 }
   0x8   :  { %p44_p3 = scmp.ne.s32.totalorder %s14_s7, %s43_s15  ;;  %p49_p5 = scmp.lt.s32.totalorder %s43_s15, %s43_s15 }
   0xa   :  { %p50_p6 = por %p49_p5, %p48_p4 }
   0xc   :  { %p51_p7 = pnand %p50_p6, %p44_p3 }
   0xe   :  { %54 = shalt.err (!%p51_p7)
}
   0xf   :  { %16 = dma.hbm_to_vmem [thread:$0]  %s83_s0, 256, %s14_s7, [#allocation3]  }
  0x10   :  { %55 = dma.done.wait [#allocation3], 256  }
  0x11   :  { %56 = vsyncadd [#allocation3], 4294967040  ;;  %v20_v0 = vld [vmem:[#allocation2] sm:$0xff]  ;;  %v21_v1 = vld [vmem:[#allocation2 + $0x8] sm:$0xff]  ;;  %vm25_vm0 = vcmask 7168  }
  0x12   :  { %v22_v2 = vmax.f32 %v20_v0, %v21_v1 }
  0x14   :  { %23 = vmax.xlane.f32.xlu0 %v22_v2 }
  0xa1   :  { %v24_v3 = vpop.xlane.xlu0 %23 }
  0xa2   :  { %26 = vst.msk [vmem:[%s84_s1] sm:$0xff] %vm25_vm0, %v24_v3 }
  0xa3   :  { %31 = vsyncpa [#allocation3], 1 }

</bundles_post_ra>
